<compile_context>
chip_gen: v5e
topology: v5e:2x2
jax: 0.10.0
libtpu: 0.0.40
codegen_flags: <defaults>
</compile_context>

<pallas_src>
import functools

import jax
import jax.numpy as jnp
from jax import lax
from jax.experimental import pallas as pl
from jax.experimental.pallas import tpu as pltpu


# ----------------------------------------------------------------------------
# Fused kernel: QKV projection (all heads) + causal softmax attention per head
# + single output projection + bias.  Grid = (batch, query tile).
# ----------------------------------------------------------------------------
def _fused_mha_kernel(x_ref, wqkv_ref, wpt_ref, b_ref, o_ref,
                      qkv_ref, cat_ref, *, num_heads, head_dim, q_tile):
    C = num_heads * head_dim
    T = x_ref.shape[1]
    q_idx = pl.program_id(1)

    # QKV projection for the whole sequence, once per batch element.  Cast the
    # result to the MXU dtype so the score matmul below runs with bf16
    # operands (accumulation stays f32 via preferred_element_type).
    @pl.when(q_idx == 0)
    def _():
        qkv_ref[...] = jnp.dot(
            x_ref[0], wqkv_ref[...],
            preferred_element_type=jnp.float32).astype(qkv_ref.dtype)

    q_start = pl.multiple_of(q_idx * q_tile, q_tile)
    q_rows = qkv_ref[pl.ds(q_start, q_tile), :]          # (TQ, 3C), mxu dtype

    # Causal mask: global row ids vs column ids, small iotas, one compare.
    row = q_start + lax.broadcasted_iota(jnp.int32, (q_tile, 1), 0)
    col = lax.broadcasted_iota(jnp.int32, (1, T), 1)
    causal = col <= row                                  # (TQ, T) bool

    # Static unroll over heads (H is small here).
    # TODO(synk): switch to lax.fori_loop with pl.ds column writes for large H.
    for h in range(num_heads):
        lo = h * head_dim
        q = q_rows[:, lo:lo + head_dim]                  # (TQ, hd), pre-scaled
        k = qkv_ref[:, C + lo:C + lo + head_dim]         # (T, hd)
        v = qkv_ref[:, 2 * C + lo:2 * C + lo + head_dim] # (T, hd)

        # s = q @ k^T via contraction dims (no explicit transpose), f32 acc.
        s = lax.dot_general(q, k, (((1,), (1,)), ((), ())),
                            preferred_element_type=jnp.float32)   # (TQ, T)
        s = jnp.where(causal, s, -jnp.inf)

        # Softmax in f32; division replaced by EUP approximate reciprocal.
        m = jnp.max(s, axis=-1, keepdims=True)
        e = jnp.exp(s - m)
        denom = jnp.sum(e, axis=-1, keepdims=True)
        p = (e * pl.reciprocal(denom, approx=True)).astype(v.dtype)

        # dropout(p=0.5) on attention probs: identity at inference.
        cat_ref[:, lo:lo + head_dim] = jnp.dot(
            p, v, preferred_element_type=jnp.float32).astype(cat_ref.dtype)

    # Single K=C output projection + bias (one MXU op instead of H small ones).
    out = jnp.dot(cat_ref[...], wpt_ref[...],
                  preferred_element_type=jnp.float32) + b_ref[...]
    # dropout(p=0.5) on projection output: identity at inference.
    o_ref[0] = out.astype(o_ref.dtype)                   # lane-dense (TQ, C)


# ----------------------------------------------------------------------------
# Wrapper: host-side weight prep + pallas_call
# ----------------------------------------------------------------------------
def multi_head_attention(x, params, *, mxu_dtype=jnp.bfloat16, q_tile=None):
    """Equivalent of MultiHeadAttention.forward (inference mode).

    x: (B, T, C).  params holds PyTorch-layout weights:
      wq/wk/wv: (H, hd, C)   (each head's nn.Linear weight, out x in)
      w_proj:   (C, C)       (out x in)
      b_proj:   (C,)
    mxu_dtype: dtype of MXU operands (bf16 peaks on v5e/v6e/v7x; softmax and
      accumulation stay f32).
    """
    B, T, C = x.shape
    H, hd, _ = params["wq"].shape
    scale = float(hd) ** -0.5

    # Query tile: largest "nice" divisor of T (keeps (TQ, T) scores bounded).
    if q_tile is None:
        q_tile = T
        for cand in (512, 256, 128):
            if T % cand == 0:
                q_tile = cand
                break
    assert T % q_tile == 0 and (q_tile % 8 == 0 or q_tile == T)
    nq = T // q_tile

    # One-time host-side prep: pre-transpose to (in, out), stack all heads'
    # Q/K/V into one (C, 3C) slab, bake the attention scale into Q columns.
    def to_in_out(w):                                  # (H, hd, C) -> (C, H*hd)
        return jnp.transpose(w, (2, 0, 1)).reshape(C, H * hd)

    wqkv = jnp.concatenate(
        [to_in_out(params["wq"]) * scale,
         to_in_out(params["wk"]),
         to_in_out(params["wv"])], axis=1).astype(mxu_dtype)        # (C, 3C)
    wpt = params["w_proj"].T.astype(mxu_dtype)                      # (C, C)
    bias = params["b_proj"].reshape(1, C).astype(jnp.float32)       # (1, C)
    x_in = x.astype(mxu_dtype)

    kernel = functools.partial(_fused_mha_kernel,
                               num_heads=H, head_dim=hd, q_tile=q_tile)

    # Explicit scoped-VMEM budget (defaults are 16/32 MiB, below real model
    # working sets even when physical VMEM would fit).
    bpe = jnp.dtype(mxu_dtype).itemsize
    est = (2 * T * C * bpe                         # x block (double-buffered)
           + 2 * q_tile * C * x.dtype.itemsize     # out block (double-buffered)
           + 4 * C * C * bpe + C * 4               # wqkv + wpt + bias (single-buffered)
           + T * 3 * C * bpe                       # qkv VMEM scratch
           + q_tile * C * bpe                      # head-concat scratch
           + 3 * q_tile * T * 4                    # scores / exp / mask temps (f32)
           + T * 3 * C * 4)                        # f32 qkv before cast
    vmem_limit = int(min(max(2 * est, 32 * 2 ** 20), 64 * 2 ** 20))

    return pl.pallas_call(
        kernel,
        out_shape=jax.ShapeDtypeStruct((B, T, C), x.dtype),
        grid_spec=pltpu.PrefetchScalarGridSpec(
            num_scalar_prefetch=0,
            grid=(B, nq),
            in_specs=[
                # Full sequence of activations; constant across the q axis so
                # it stays resident until the batch index changes.
                pl.BlockSpec((1, T, C), lambda b, q: (b, 0, 0)),
                # Weights/bias: constant block index + single buffer (no
                # re-DMA, no wasted second buffer).
                pl.BlockSpec((C, 3 * C), lambda b, q: (0, 0),
                             pipeline_mode=pl.Buffered(1)),
                pl.BlockSpec((C, C), lambda b, q: (0, 0),
                             pipeline_mode=pl.Buffered(1)),
                pl.BlockSpec((1, C), lambda b, q: (0, 0),
                             pipeline_mode=pl.Buffered(1)),
            ],
            out_specs=pl.BlockSpec((1, q_tile, C), lambda b, q: (b, q, 0)),
            scratch_shapes=[
                pltpu.VMEM((T, 3 * C), mxu_dtype),    # per-batch QKV
                pltpu.VMEM((q_tile, C), mxu_dtype),   # concatenated head outs
            ],
        ),
        compiler_params=pltpu.CompilerParams(
            dimension_semantics=("parallel", "arbitrary"),
            vmem_limit_bytes=vmem_limit),
    )(x_in, wqkv, wpt, bias)


def init_params(key, num_heads, emb_dim):
    head_dim = emb_dim // num_heads
    k1, k2, k3, k4, k5 = jax.random.split(key, 5)
    lim = 1.0 / (emb_dim ** 0.5)
    wq = jax.random.uniform(k1, (num_heads, head_dim, emb_dim), jnp.float32, -lim, lim)
    wk = jax.random.uniform(k2, (num_heads, head_dim, emb_dim), jnp.float32, -lim, lim)
    wv = jax.random.uniform(k3, (num_heads, head_dim, emb_dim), jnp.float32, -lim, lim)
    w_proj = jax.random.uniform(k4, (emb_dim, emb_dim), jnp.float32, -lim, lim)
    b_proj = jax.random.uniform(k5, (emb_dim,), jnp.float32, -lim, lim)
    return {"wq": wq, "wk": wk, "wv": wv, "w_proj": w_proj, "b_proj": b_proj}


# Pure-JAX reference (matches the PyTorch module, dropout = identity).
def _reference(x, params):
    H, hd, C = params["wq"].shape
    B, T, _ = x.shape
    outs = []
    for h in range(H):
        q = x @ params["wq"][h].T
        k = x @ params["wk"][h].T
        v = x @ params["wv"][h].T
        s = (q @ jnp.swapaxes(k, -2, -1)) * (hd ** -0.5)
        mask = jnp.tril(jnp.ones((T, T), dtype=bool))
        s = jnp.where(mask, s, -jnp.inf)
        p = jax.nn.softmax(s, axis=-1)
        outs.append(p @ v)
    cat = jnp.concatenate(outs, axis=-1)
    return cat @ params["w_proj"].T + params["b_proj"]


if __name__ == "__main__":
    num_heads = 4
    emb_dim = 32
    B, T = 2, 8     # block_size == T

    key = jax.random.PRNGKey(0)
    kx, kp = jax.random.split(key)
    x = jax.random.normal(kx, (B, T, emb_dim), jnp.float32)
    params = init_params(kp, num_heads, emb_dim)

    out = multi_head_attention(x, params)          # bf16 MXU operands
    out = jax.block_until_ready(out)

    ref = _reference(x, params)
    assert out.shape == (B, T, emb_dim)
    # Tolerance accounts for bf16 MXU operands + EUP approximate reciprocal
    # in the softmax normalization (accumulation is f32).
    assert jnp.allclose(out, ref, atol=5e-2, rtol=5e-2), "mismatch vs reference"

    print("KERNEL_OK")
</pallas_src>

<mosaic_0001>
module attributes {stable_mosaic.version = 11 : i64} {
  func.func @_fused_mha_kernel(%arg0: i32, %arg1: i32, %arg2: memref<1x8x32xbf16, #tpu.memory_space<vmem>>, %arg3: memref<32x96xbf16, #tpu.memory_space<vmem>>, %arg4: memref<32x32xbf16, #tpu.memory_space<vmem>>, %arg5: memref<1x32xf32, #tpu.memory_space<vmem>>, %arg6: memref<1x8x32xf32, #tpu.memory_space<vmem>>, %arg7: memref<8x96xbf16, #tpu.memory_space<vmem>>, %arg8: memref<8x32xbf16, #tpu.memory_space<vmem>>) attributes {dimension_semantics = [#tpu.dimension_semantics<parallel>, #tpu.dimension_semantics<arbitrary>], iteration_bounds = array<i64: 2, 1>, scalar_prefetch = 0 : i64, scratch_operands = 2 : i64, tpu.core_type = #tpu.core_type<tc>, window_params = [{transform_indices = @transform_0, window_bounds = array<i64: 1, 8, 32>}, {pipeline_mode = #tpu.pipeline_mode<synchronous>, transform_indices = @transform_1, window_bounds = array<i64: 32, 96>}, {pipeline_mode = #tpu.pipeline_mode<synchronous>, transform_indices = @transform_2, window_bounds = array<i64: 32, 32>}, {pipeline_mode = #tpu.pipeline_mode<synchronous>, transform_indices = @transform_3, window_bounds = array<i64: 1, 32>}, {transform_indices = @transform_4, window_bounds = array<i64: 1, 8, 32>}]} {
    %c0_i32 = arith.constant 0 : i32
    %0 = arith.cmpi eq, %arg1, %c0_i32 : i32
    %1 = arith.extui %0 : i1 to i32
    %c0_i32_0 = arith.constant 0 : i32
    %2 = arith.cmpi ne, %1, %c0_i32_0 : i32
    scf.if %2 {
      %c0_43 = arith.constant 0 : index
      %c0_44 = arith.constant 0 : index
      %c0_45 = arith.constant 0 : index
      %103 = vector.load %arg2[%c0_43, %c0_44, %c0_45] : memref<1x8x32xbf16, #tpu.memory_space<vmem>>, vector<1x8x32xbf16>
      %104 = vector.shape_cast %103 : vector<1x8x32xbf16> to vector<8x32xbf16>
      %c0_46 = arith.constant 0 : index
      %c0_47 = arith.constant 0 : index
      %105 = vector.load %arg3[%c0_46, %c0_47] : memref<32x96xbf16, #tpu.memory_space<vmem>>, vector<32x96xbf16>
      %cst_48 = arith.constant dense<0.000000e+00> : vector<8x96xf32>
      %106 = tpu.matmul %104, %105, %cst_48 {dimension_numbers = #tpu.dot_dimension_numbers<[1], [0], [0], [1], [0, 0, 1, 1], [], []>} : vector<8x32xbf16>, vector<32x96xbf16>, vector<8x96xf32> -> vector<8x96xf32>
      %107 = arith.truncf %106 : vector<8x96xf32> to vector<8x96xbf16>
      %c0_49 = arith.constant 0 : index
      %c0_50 = arith.constant 0 : index
      %108 = vector.load %arg7[%c0_49, %c0_50] : memref<8x96xbf16, #tpu.memory_space<vmem>>, vector<8x96xbf16>
      tpu.vector_store %arg7[%c0_49, %c0_50], %107 {strides = array<i32>} : memref<8x96xbf16, #tpu.memory_space<vmem>>, vector<8x96xbf16>,
    } else {
    }
    %c8_i32 = arith.constant 8 : i32
    %3 = arith.muli %arg1, %c8_i32 : i32
    %4 = tpu.assume_multiple %3, 8 : i32
    %5 = arith.index_cast %4 : i32 to index
    %c0 = arith.constant 0 : index
    %6 = vector.load %arg7[%5, %c0] : memref<8x96xbf16, #tpu.memory_space<vmem>>, vector<8x96xbf16>
    %7 = tpu.iota {dimensions = array<i32: 0>} : vector<8x1xi32>
    %8 = vector.broadcast %4 : i32 to vector<8x1xi32>
    %9 = arith.addi %8, %7 : vector<8x1xi32>
    %10 = tpu.iota {dimensions = array<i32: 1>} : vector<1x8xi32>
    %11 = vector.broadcast %10 : vector<1x8xi32> to vector<8x8xi32>
    %12 = vector.broadcast %9 : vector<8x1xi32> to vector<8x8xi32>
    %13 = arith.cmpi sle, %11, %12 : vector<8x8xi32>
    %14 = vector.extract_strided_slice %6 {offsets = [0, 0], sizes = [8, 8], strides = [1, 1]} : vector<8x96xbf16> to vector<8x8xbf16>
    %c0_1 = arith.constant 0 : index
    %c32 = arith.constant 32 : index
    %15 = vector.load %arg7[%c0_1, %c32] : memref<8x96xbf16, #tpu.memory_space<vmem>>, vector<8x8xbf16>
    %c0_2 = arith.constant 0 : index
    %c64 = arith.constant 64 : index
    %16 = vector.load %arg7[%c0_2, %c64] : memref<8x96xbf16, #tpu.memory_space<vmem>>, vector<8x8xbf16>
    %cst = arith.constant dense<0.000000e+00> : vector<8x8xf32>
    %17 = tpu.matmul %14, %15, %cst {dimension_numbers = #tpu.dot_dimension_numbers<[1], [1], [0], [0], [0, 0, 1, 0], [], []>} : vector<8x8xbf16>, vector<8x8xbf16>, vector<8x8xf32> -> vector<8x8xf32>
    %cst_3 = arith.constant 0xFF800000 : f32
    %18 = vector.broadcast %cst_3 : f32 to vector<8x8xf32>
    %19 = arith.select %13, %17, %18 : vector<8x8xi1>, vector<8x8xf32>
    %cst_4 = arith.constant dense<0xFF800000> : vector<8xf32>
    %20 = vector.multi_reduction <maximumf>, %19, %cst_4 [1] : vector<8x8xf32> to vector<8xf32>
    %21 = vector.shape_cast %20 : vector<8xf32> to vector<8x1xf32>
    %22 = vector.broadcast %21 : vector<8x1xf32> to vector<8x8xf32>
    %23 = arith.subf %19, %22 : vector<8x8xf32>
    %24 = math.exp %23 : vector<8x8xf32>
    %cst_5 = arith.constant dense<0.000000e+00> : vector<8xf32>
    %25 = vector.multi_reduction <add>, %24, %cst_5 [1] : vector<8x8xf32> to vector<8xf32>
    %26 = vector.shape_cast %25 : vector<8xf32> to vector<8x1xf32>
    %27 = tpu.reciprocal %26 {approx = true} : vector<8x1xf32> -> vector<8x1xf32>
    %28 = vector.broadcast %27 : vector<8x1xf32> to vector<8x8xf32>
    %29 = arith.mulf %24, %28 : vector<8x8xf32>
    %30 = arith.truncf %29 : vector<8x8xf32> to vector<8x8xbf16>
    %cst_6 = arith.constant dense<0.000000e+00> : vector<8x8xf32>
    %31 = tpu.matmul %30, %16, %cst_6 {dimension_numbers = #tpu.dot_dimension_numbers<[1], [0], [0], [1], [0, 0, 1, 1], [], []>} : vector<8x8xbf16>, vector<8x8xbf16>, vector<8x8xf32> -> vector<8x8xf32>
    %32 = arith.truncf %31 : vector<8x8xf32> to vector<8x8xbf16>
    %c0_7 = arith.constant 0 : index
    %c0_8 = arith.constant 0 : index
    %33 = vector.load %arg8[%c0_7, %c0_8] : memref<8x32xbf16, #tpu.memory_space<vmem>>, vector<8x8xbf16>
    tpu.vector_store %arg8[%c0_7, %c0_8], %32 {strides = array<i32>} : memref<8x32xbf16, #tpu.memory_space<vmem>>, vector<8x8xbf16>,
    %34 = vector.extract_strided_slice %6 {offsets = [0, 8], sizes = [8, 8], strides = [1, 1]} : vector<8x96xbf16> to vector<8x8xbf16>
    %c0_9 = arith.constant 0 : index
    %c40 = arith.constant 40 : index
    %35 = vector.load %arg7[%c0_9, %c40] : memref<8x96xbf16, #tpu.memory_space<vmem>>, vector<8x8xbf16>
    %c0_10 = arith.constant 0 : index
    %c72 = arith.constant 72 : index
    %36 = vector.load %arg7[%c0_10, %c72] : memref<8x96xbf16, #tpu.memory_space<vmem>>, vector<8x8xbf16>
    %cst_11 = arith.constant dense<0.000000e+00> : vector<8x8xf32>
    %37 = tpu.matmul %34, %35, %cst_11 {dimension_numbers = #tpu.dot_dimension_numbers<[1], [1], [0], [0], [0, 0, 1, 0], [], []>} : vector<8x8xbf16>, vector<8x8xbf16>, vector<8x8xf32> -> vector<8x8xf32>
    %cst_12 = arith.constant 0xFF800000 : f32
    %38 = vector.broadcast %cst_12 : f32 to vector<8x8xf32>
    %39 = arith.select %13, %37, %38 : vector<8x8xi1>, vector<8x8xf32>
    %cst_13 = arith.constant dense<0xFF800000> : vector<8xf32>
    %40 = vector.multi_reduction <maximumf>, %39, %cst_13 [1] : vector<8x8xf32> to vector<8xf32>
    %41 = vector.shape_cast %40 : vector<8xf32> to vector<8x1xf32>
    %42 = vector.broadcast %41 : vector<8x1xf32> to vector<8x8xf32>
    %43 = arith.subf %39, %42 : vector<8x8xf32>
    %44 = math.exp %43 : vector<8x8xf32>
    %cst_14 = arith.constant dense<0.000000e+00> : vector<8xf32>
    %45 = vector.multi_reduction <add>, %44, %cst_14 [1] : vector<8x8xf32> to vector<8xf32>
    %46 = vector.shape_cast %45 : vector<8xf32> to vector<8x1xf32>
    %47 = tpu.reciprocal %46 {approx = true} : vector<8x1xf32> -> vector<8x1xf32>
    %48 = vector.broadcast %47 : vector<8x1xf32> to vector<8x8xf32>
    %49 = arith.mulf %44, %48 : vector<8x8xf32>
    %50 = arith.truncf %49 : vector<8x8xf32> to vector<8x8xbf16>
    %cst_15 = arith.constant dense<0.000000e+00> : vector<8x8xf32>
    %51 = tpu.matmul %50, %36, %cst_15 {dimension_numbers = #tpu.dot_dimension_numbers<[1], [0], [0], [1], [0, 0, 1, 1], [], []>} : vector<8x8xbf16>, vector<8x8xbf16>, vector<8x8xf32> -> vector<8x8xf32>
    %52 = arith.truncf %51 : vector<8x8xf32> to vector<8x8xbf16>
    %c0_16 = arith.constant 0 : index
    %c8 = arith.constant 8 : index
    %53 = vector.load %arg8[%c0_16, %c8] : memref<8x32xbf16, #tpu.memory_space<vmem>>, vector<8x8xbf16>
    tpu.vector_store %arg8[%c0_16, %c8], %52 {strides = array<i32>} : memref<8x32xbf16, #tpu.memory_space<vmem>>, vector<8x8xbf16>,
    %54 = vector.extract_strided_slice %6 {offsets = [0, 16], sizes = [8, 8], strides = [1, 1]} : vector<8x96xbf16> to vector<8x8xbf16>
    %c0_17 = arith.constant 0 : index
    %c48 = arith.constant 48 : index
    %55 = vector.load %arg7[%c0_17, %c48] : memref<8x96xbf16, #tpu.memory_space<vmem>>, vector<8x8xbf16>
    %c0_18 = arith.constant 0 : index
    %c80 = arith.constant 80 : index
    %56 = vector.load %arg7[%c0_18, %c80] : memref<8x96xbf16, #tpu.memory_space<vmem>>, vector<8x8xbf16>
    %cst_19 = arith.constant dense<0.000000e+00> : vector<8x8xf32>
    %57 = tpu.matmul %54, %55, %cst_19 {dimension_numbers = #tpu.dot_dimension_numbers<[1], [1], [0], [0], [0, 0, 1, 0], [], []>} : vector<8x8xbf16>, vector<8x8xbf16>, vector<8x8xf32> -> vector<8x8xf32>
    %cst_20 = arith.constant 0xFF800000 : f32
    %58 = vector.broadcast %cst_20 : f32 to vector<8x8xf32>
    %59 = arith.select %13, %57, %58 : vector<8x8xi1>, vector<8x8xf32>
    %cst_21 = arith.constant dense<0xFF800000> : vector<8xf32>
    %60 = vector.multi_reduction <maximumf>, %59, %cst_21 [1] : vector<8x8xf32> to vector<8xf32>
    %61 = vector.shape_cast %60 : vector<8xf32> to vector<8x1xf32>
    %62 = vector.broadcast %61 : vector<8x1xf32> to vector<8x8xf32>
    %63 = arith.subf %59, %62 : vector<8x8xf32>
    %64 = math.exp %63 : vector<8x8xf32>
    %cst_22 = arith.constant dense<0.000000e+00> : vector<8xf32>
    %65 = vector.multi_reduction <add>, %64, %cst_22 [1] : vector<8x8xf32> to vector<8xf32>
    %66 = vector.shape_cast %65 : vector<8xf32> to vector<8x1xf32>
    %67 = tpu.reciprocal %66 {approx = true} : vector<8x1xf32> -> vector<8x1xf32>
    %68 = vector.broadcast %67 : vector<8x1xf32> to vector<8x8xf32>
    %69 = arith.mulf %64, %68 : vector<8x8xf32>
    %70 = arith.truncf %69 : vector<8x8xf32> to vector<8x8xbf16>
    %cst_23 = arith.constant dense<0.000000e+00> : vector<8x8xf32>
    %71 = tpu.matmul %70, %56, %cst_23 {dimension_numbers = #tpu.dot_dimension_numbers<[1], [0], [0], [1], [0, 0, 1, 1], [], []>} : vector<8x8xbf16>, vector<8x8xbf16>, vector<8x8xf32> -> vector<8x8xf32>
    %72 = arith.truncf %71 : vector<8x8xf32> to vector<8x8xbf16>
    %c0_24 = arith.constant 0 : index
    %c16 = arith.constant 16 : index
    %73 = vector.load %arg8[%c0_24, %c16] : memref<8x32xbf16, #tpu.memory_space<vmem>>, vector<8x8xbf16>
    tpu.vector_store %arg8[%c0_24, %c16], %72 {strides = array<i32>} : memref<8x32xbf16, #tpu.memory_space<vmem>>, vector<8x8xbf16>,
    %74 = vector.extract_strided_slice %6 {offsets = [0, 24], sizes = [8, 8], strides = [1, 1]} : vector<8x96xbf16> to vector<8x8xbf16>
    %c0_25 = arith.constant 0 : index
    %c56 = arith.constant 56 : index
    %75 = vector.load %arg7[%c0_25, %c56] : memref<8x96xbf16, #tpu.memory_space<vmem>>, vector<8x8xbf16>
    %c0_26 = arith.constant 0 : index
    %c88 = arith.constant 88 : index
    %76 = vector.load %arg7[%c0_26, %c88] : memref<8x96xbf16, #tpu.memory_space<vmem>>, vector<8x8xbf16>
    %cst_27 = arith.constant dense<0.000000e+00> : vector<8x8xf32>
    %77 = tpu.matmul %74, %75, %cst_27 {dimension_numbers = #tpu.dot_dimension_numbers<[1], [1], [0], [0], [0, 0, 1, 0], [], []>} : vector<8x8xbf16>, vector<8x8xbf16>, vector<8x8xf32> -> vector<8x8xf32>
    %cst_28 = arith.constant 0xFF800000 : f32
    %78 = vector.broadcast %cst_28 : f32 to vector<8x8xf32>
    %79 = arith.select %13, %77, %78 : vector<8x8xi1>, vector<8x8xf32>
    %cst_29 = arith.constant dense<0xFF800000> : vector<8xf32>
    %80 = vector.multi_reduction <maximumf>, %79, %cst_29 [1] : vector<8x8xf32> to vector<8xf32>
    %81 = vector.shape_cast %80 : vector<8xf32> to vector<8x1xf32>
    %82 = vector.broadcast %81 : vector<8x1xf32> to vector<8x8xf32>
    %83 = arith.subf %79, %82 : vector<8x8xf32>
    %84 = math.exp %83 : vector<8x8xf32>
    %cst_30 = arith.constant dense<0.000000e+00> : vector<8xf32>
    %85 = vector.multi_reduction <add>, %84, %cst_30 [1] : vector<8x8xf32> to vector<8xf32>
    %86 = vector.shape_cast %85 : vector<8xf32> to vector<8x1xf32>
    %87 = tpu.reciprocal %86 {approx = true} : vector<8x1xf32> -> vector<8x1xf32>
    %88 = vector.broadcast %87 : vector<8x1xf32> to vector<8x8xf32>
    %89 = arith.mulf %84, %88 : vector<8x8xf32>
    %90 = arith.truncf %89 : vector<8x8xf32> to vector<8x8xbf16>
    %cst_31 = arith.constant dense<0.000000e+00> : vector<8x8xf32>
    %91 = tpu.matmul %90, %76, %cst_31 {dimension_numbers = #tpu.dot_dimension_numbers<[1], [0], [0], [1], [0, 0, 1, 1], [], []>} : vector<8x8xbf16>, vector<8x8xbf16>, vector<8x8xf32> -> vector<8x8xf32>
    %92 = arith.truncf %91 : vector<8x8xf32> to vector<8x8xbf16>
    %c0_32 = arith.constant 0 : index
    %c24 = arith.constant 24 : index
    %93 = vector.load %arg8[%c0_32, %c24] : memref<8x32xbf16, #tpu.memory_space<vmem>>, vector<8x8xbf16>
    tpu.vector_store %arg8[%c0_32, %c24], %92 {strides = array<i32>} : memref<8x32xbf16, #tpu.memory_space<vmem>>, vector<8x8xbf16>,
    %c0_33 = arith.constant 0 : index
    %c0_34 = arith.constant 0 : index
    %94 = vector.load %arg8[%c0_33, %c0_34] : memref<8x32xbf16, #tpu.memory_space<vmem>>, vector<8x32xbf16>
    %c0_35 = arith.constant 0 : index
    %c0_36 = arith.constant 0 : index
    %95 = vector.load %arg4[%c0_35, %c0_36] : memref<32x32xbf16, #tpu.memory_space<vmem>>, vector<32x32xbf16>
    %cst_37 = arith.constant dense<0.000000e+00> : vector<8x32xf32>
    %96 = tpu.matmul %94, %95, %cst_37 {dimension_numbers = #tpu.dot_dimension_numbers<[1], [0], [0], [1], [0, 0, 1, 1], [], []>} : vector<8x32xbf16>, vector<32x32xbf16>, vector<8x32xf32> -> vector<8x32xf32>
    %c0_38 = arith.constant 0 : index
    %c0_39 = arith.constant 0 : index
    %97 = vector.load %arg5[%c0_38, %c0_39] : memref<1x32xf32, #tpu.memory_space<vmem>>, vector<1x32xf32>
    %98 = vector.broadcast %97 : vector<1x32xf32> to vector<8x32xf32>
    %99 = arith.addf %96, %98 : vector<8x32xf32>
    %c0_40 = arith.constant 0 : index
    %c0_41 = arith.constant 0 : index
    %c0_42 = arith.constant 0 : index
    %100 = vector.load %arg6[%c0_40, %c0_41, %c0_42] : memref<1x8x32xf32, #tpu.memory_space<vmem>>, vector<1x8x32xf32>
    %101 = vector.shape_cast %100 : vector<1x8x32xf32> to vector<8x32xf32>
    %102 = vector.shape_cast %99 : vector<8x32xf32> to vector<1x8x32xf32>
    tpu.vector_store %arg6[%c0_40, %c0_41, %c0_42], %102 {strides = array<i32>} : memref<1x8x32xf32, #tpu.memory_space<vmem>>, vector<1x8x32xf32>,
    return
  }
  func.func @transform_0(%arg0: i32, %arg1: i32) -> (i32, i32, i32) {
    %c0_i32 = arith.constant 0 : i32
    %c0_i32_0 = arith.constant 0 : i32
    %c0_i32_1 = arith.constant 0 : i32
    return %arg0, %c0_i32, %c0_i32_0 : i32, i32, i32
  }
  func.func @transform_1(%arg0: i32, %arg1: i32) -> (i32, i32) {
    %c0_i32 = arith.constant 0 : i32
    %c0_i32_0 = arith.constant 0 : i32
    %c0_i32_1 = arith.constant 0 : i32
    return %c0_i32, %c0_i32_0 : i32, i32
  }
  func.func @transform_2(%arg0: i32, %arg1: i32) -> (i32, i32) {
    %c0_i32 = arith.constant 0 : i32
    %c0_i32_0 = arith.constant 0 : i32
    %c0_i32_1 = arith.constant 0 : i32
    return %c0_i32, %c0_i32_0 : i32, i32
  }
  func.func @transform_3(%arg0: i32, %arg1: i32) -> (i32, i32) {
    %c0_i32 = arith.constant 0 : i32
    %c0_i32_0 = arith.constant 0 : i32
    %c0_i32_1 = arith.constant 0 : i32
    return %c0_i32, %c0_i32_0 : i32, i32
  }
  func.func @transform_4(%arg0: i32, %arg1: i32) -> (i32, i32, i32) {
    %c0_i32 = arith.constant 0 : i32
    %c0_i32_0 = arith.constant 0 : i32
    return %arg0, %arg1, %c0_i32 : i32, i32, i32
  }
}

</mosaic_0001>

<bundles_post_ra>
// kernel: tpu_custom_call.1
= control target key start
LH: loop header
LB: loop body
LE: loop exit
PB: predicated region body
PF: predicated region fallthrough
CT: control target
= control target key end

     0   :  { %9 = vsyncpa [#allocation5], 0  ;;  %s1319_s0 = inlined_call_operand.hbm [shape: bf16[2,8,32], index: 0, kind: input, shape index: {}]   ;;  %s1320_s1 = inlined_call_operand.hbm [shape: bf16[32,96], index: 1, kind: input, shape index: {}]   ;;  %s1321_s2 = inlined_call_operand.hbm [shape: bf16[32,32], index: 2, kind: input, shape index: {}]   ;;  %s1322_s3 = inlined_call_operand.vmem [shape: f32[1,32], index: 3, kind: input, shape index: {}]   ;;  %s1323_s4 = inlined_call_operand.hbm [shape: f32[2,8,32], index: 4, kind: output, shape index: {}]  }
   0x1   :  { %11 = vsyncpa [#allocation5 + $0x1], 0 }
   0x2   :  { %12 = vsyncpa [#allocation8], 0 }
   0x3   :  { %13 = vsyncpa [#allocation6], 0 }
   0x4   :  { %15 = vsyncpa [#allocation6 + $0x1], 0  ;;  %s1128_s15 = smov 0   ;;  %s1130_s16 = smov 0  }
   0x5   :  { %s1132_s17 = smov 0   ;;  %s1134_s18 = smov 0  }
   0x6   :  { %s1136_s19 = smov 0   ;;  %s1138_s20 = smov 0  }
   0x7 LB: > { %s744_s21 = sadd.s32 4294967295, %s1083_s20   ;;  %p746_p0 = scmp.ge.s32.totalorder %s1083_s20, 1  ;;  %s1083_s20 = sphi %s1138_s20, %s21_s20   ;;  %s1079_s19 = sphi %s1136_s19, %s1333_s19   ;;  %s1075_s18 = sphi %s1134_s18, %s1332_s18   ;;  %s1071_s17 = sphi %s1132_s17, %s1331_s17   ;;  %s1067_s16 = sphi %s1130_s16, %s1330_s16   ;;  %s1063_s15 = sphi %s1128_s15, %s1329_s15  }
   0x8   : > { %p1162_p1 = scmp.eq.s32.totalorder %s744_s21, 0  ;;  %p155_p2 = scmp.lt.s32.totalorder %s1083_s20, 3 }
   0x9   : > { %s166_s25 = sshll.u32 %s1320_s1, 4  ;;  %s1085_s27 = smov [#allocation7]   ;;  %s167_s25 = int_to_ptr.hbm [resolvable:$true] %s166_s25 }
   0xa   : > { %p1170_p3 = pnand %p746_p0, %p155_p2  ;;  %s168_s28 = sshll.u32 %s1085_s27, 4  ;;  %s169_s28 = int_to_ptr.vmem [resolvable:$true] %s168_s28 }
   0xb   : > { %p749_p6 = scmp.ge.s32.totalorder %s1083_s20, 2  ;;  %s180_s5 = sshll.u32 %s1321_s2, 4  ;;  %s181_s5 = int_to_ptr.hbm [resolvable:$true] %s180_s5 }
   0xc   : > { %p803_p4 = pneg %p1170_p3  ;;  %s1086_s6 = smov 64  }
   0xd   : > { %s1087_s7 = smov 4   ;;  %s1088_s8 = smov [#allocation9]  }
   0xe   : > { %p804_p5 = pnand %p803_p4, %p1162_p1  ;;  %s182_s9 = sshll.u32 %s1088_s8, 4  ;;  %s183_s9 = int_to_ptr.vmem [resolvable:$true] %s182_s9 }
   0xf   : > { %s33_s10 = sadd.s32 1, %s1079_s19  ;;  %s745_s11 = sadd.s32 4294967294, %s1083_s20  }
  0x10   : > { %806 = dma.hbm_to_vmem [thread:$0]  (!%p804_p5), %s167_s25, 256, %s169_s28, [#allocation8], %s1086_s6, %s1086_s6, %s1087_s7  }
  0x11   : > { %809 = dma.hbm_to_vmem [thread:$0]  (!%p804_p5), %s181_s5, 256, %s183_s9, [#allocation8], %s1086_s6, %s1086_s6, %s1087_s7  }
  0x12   : > { %p35_p7 = scmp.ge.s32.totalorder %s33_s10, 2  ;;  %s40_s12 = sadd.s32 1, %s1071_s17 }
  0x13   : > { %p47_p8 = scmp.ne.s32.totalorder %s1071_s17, %s1067_s16  ;;  %p48_p9 = scmp.eq.s32.totalorder %s1083_s20, 0 }
  0x14   : > { %s1335_s10 = smov (%p35_p7, %s33_s10), 0  ;;  %p53_p10 = scmp.ne.s32.totalorder %s1067_s16, %s1063_s15 }
  0x15   : > { %s37_s13 = ssub.s32 %s1079_s19, %s1335_s10  ;;  %p142_p11 = scmp.eq.s32.totalorder %s744_s21, 1 }
  0x16   : > { %p38_p12 = scmp.eq.s32.totalorder %s37_s13, 0  ;;  %p1198_p13 = por %p1162_p1, %p53_p10 }
  0x17   : > { %p1202_p0 = por %p142_p11, %p47_p8  ;;  %p148_p2 = scmp.eq.s32.totalorder %s745_s11, 1 }
  0x18   : > { %s1207_s24 = scalar_select %p38_p12, %s1071_s17, %s40_s12  }
  0x19   : > { %p49_p4 = por %p48_p9, %p47_p8  ;;  %p1209_p5 = por %p148_p2, %p53_p10 }
  0x1a   : > { %s199_s27 = sand.u32 1, %s1071_s17   ;;  %s751_s21 = sshll.u32 %s1079_s19, 2 }
  0x1b   : > { %p820_p7 = scmp.lt.s32.totalorder %s1083_s20, 2  ;;  %s750_s28 = sshll.u32 %s199_s27, 2 }
  0x1c   : > { %s207_s5 = scalar_lea.hbm %s1319_s0, %s751_s21  ;;  %s203_s7 = scalar_lea.vmem [#allocation4], %s750_s28 }
  0x1d   : > { %s209_s6 = sshll.u32 %s207_s5, 4  ;;  %s211_s8 = sshll.u32 %s203_s7, 4  ;;  %s210_s6 = int_to_ptr.hbm [resolvable:$true] %s209_s6  ;;  %s212_s8 = int_to_ptr.vmem [resolvable:$true] %s211_s8 }
  0x1e   : > { %p811_p11 = pnand %p820_p7, %p49_p4  ;;  %s200_s9 = scalar_lea.sflag [#allocation5], %s199_s27 }
  0x1f   : > { %220 = sbr.rel (%p1170_p3) target bundleno = 1130 (0x46a), region = 36  ;;  %s1222_s11 = sand.u32 (!%p1170_p3), 1, %s1067_s16  }
  0x20   : > { %813 = dma.hbm_to_vmem [thread:$0]  (!%p811_p11), %s210_s6, 64, %s212_s8, %s200_s9  }
  0x21   : > { %s753_s12 = sshll.u32 (!%p1170_p3), %s1222_s11, 2  ;;  %s223_s13 = scalar_lea.sflag (!%p1170_p3), [#allocation5], %s1222_s11 }
  0x22   : > { %s226_s21 = scalar_lea.vmem (!%p1170_p3), [#allocation4], %s753_s12 }
  0x24   : > { %1050 = dma.done.wait (%p1198_p13), %s223_s13, 64  }
  0x25   : > { %1052 = vsyncadd (%p1198_p13), %s223_s13, 4294967232 }
  0x26   : > { %1054 = dma.done.wait (%p1162_p1), [#allocation8], 512  }
  0x27   : > { %1056 = vsyncadd (%p1162_p1), [#allocation8], 4294966784  ;;  %v788_v0 = vld [vmem:[#allocation7 + $0x8] sm:$0xff]  ;;  %v787_v1 = vld [vmem:[#allocation7] sm:$0xff]  ;;  %vm284_vm0 = vcmask 261120   ;;  %vm302_vm1 = vcmask 781312   ;;  %v310_v32 = vlaneseq }
  0x28   : > { %294 = vmatpush.bf16.msra.mxu0 %v788_v0  ;;  %v267_v2 = vld [vmem:[%s226_s21] sm:$0xf]  ;;  %s1089_s22 = smov 96   ;;  %s1090_s26 = smov 104   ;;  %vm323_vm2 = vcmask 64512   ;;  %vm361_vm4 = vcmask 1043456  }
  0x29   : > { %s1091_s14 = smov 120   ;;  %s1092_s27 = smov 88   ;;  %v311_v33 = vshrl.u32 %v310_v32, 7  ;;  %v315_v34 = vand.u32 127, %v310_v32  ;;  %vm379_vm5 = vcmask 60416   ;;  %vm450_vm6 = vcmask 126016  }
  0x2a   : > { %s1093_s28 = smov 80   ;;  %s1094_s29 = smov 72   ;;  %vm518_vm7 = vcmask 191616   ;;  %vm586_vm8 = vcmask 257216  }
  0x2b   : > { %s1095_s30 = smov 112   ;;  %vm316_vm3 = vcmp.le.s32.totalorder %v315_v34, %v311_v33  ;;  %s1096_s5 = smov 64  }
  0x2c   : > { %295 = vmatpush.bf16.msra.mxu0 %v787_v1  ;;  %s1097_s6 = smov 40   ;;  %s1098_s7 = smov 56  }
  0x2d   : > { %s1099_s8 = smov 48   ;;  %s1100_s9 = smov 8  }
  0x2e   : > { %s1101_s12 = smov 16   ;;  %s1102_s13 = smov 24  }
  0x2f   : > { %765 = vmatmul.msk.bf16.vlgmr.msra.gmra.mxu0 %vm284_vm0, %v267_v2  ;;  %s784_s21 = sshll.u32 %s1075_s18, 3  ;;  %s628_s18 = scalar_lea.sflag [#allocation6], %s1222_s11 }
  0xac   : > { %v297_v3 = vpop.f32.mrf.mxu0 }
  0xad   : > { %v301_v4 = vpack.c.bf16 %v297_v3, %v297_v3 }
  0xaf   : > { %303 = vst.msk [vmem:[#allocation2] sm:$0xf] %vm302_vm1, %v301_v4 }
  0xb4   : > { %v299_v5 = vpop.f32.mrf.mxu0 }
  0xb6   : > { %v317_v6 = vld [vmem:[#allocation2] sm:$0xf] }
  0xb7   : > { %v309_v7 = vld [vmem:[#allocation2] sm:$0xf]  ;;  %v319_v8 = vunpack.c.l.b16 %v317_v6 }
  0xb8   : > { %v383_v9 = vunpack.c.l.b16 %v309_v7  ;;  %v381_v12 = vld [vmem:[#allocation2] sm:$0xf] }
  0xb9   : > { %v1235_v10 = vpack.c.b16 %v319_v8, %v319_v8  ;;  %v452_v13 = vld [vmem:[#allocation2] sm:$0xf]  ;;  %v388_v15 = vunpack.c.l.b16 %v381_v12 }
  0xba   : > { %v384_v11 = vpack.c.b16 %v383_v9, %v383_v9  ;;  %v520_v14 = vld [vmem:[#allocation2] sm:$0xf]  ;;  %v456_v16 = vunpack.c.l.b16 %v452_v13 }
  0xbb   : > { %321 = vrot.lane.b32.xlu0 %v1235_v10, %s1089_s22  ;;  %v524_v17 = vunpack.c.l.b16 %v520_v14  ;;  %v1238_v18 = vpack.c.b16 %v388_v15, %v388_v15  ;;  %s756_s22 = sshll.u32 %s1222_s11, 3 }
  0xbc   : > { %521 = vrot.lane.b32.xlu2 %v384_v11, %s1090_s26  ;;  %385 = vrot.lane.b32.xlu1 %v384_v11, %s1091_s14  ;;  %v1240_v19 = vpack.c.b16 %v456_v16, %v456_v16 }
  0xbd   : > { %v525_v20 = vpack.c.b16 %v524_v17, %v524_v17 }
  0xc3   : > { %390 = vrot.lane.b32.xlu0 %v1238_v18, %s1092_s27  ;;  %s639_s27 = scalar_lea.hbm %s1323_s4, %s784_s21 }
  0xc4   : > { %458 = vrot.lane.b32.xlu2 %v1240_v19, %s1093_s28  ;;  %526 = vrot.lane.b32.xlu1 %v525_v20, %s1094_s29 }
  0xcb   : > { %453 = vrot.lane.b32.xlu0 %v384_v11, %s1095_s30  ;;  %s261_s30 = scalar_lea.vmem [#allocation10], %s756_s22 }
 0x116   : > { %v522_v21 = vpop.permute.xlu2 %521 }
 0x11e   : > { %v459_v22 = vpop.permute.xlu2 %458 }
 0x11f   : > { %v464_v23 = vsel %vm323_vm2, %v459_v22, 0 }
 0x120   : > { %473 = vmatpush.bf16.xpose.msrb.mxu0 %v464_v23 }
 0x12d   : > { %v322_v24 = vpop.permute.xlu0 %321 }
 0x12e   : > { %v386_v25 = vpop.permute.xlu1 %385  ;;  %v328_v26 = vsel %vm323_vm2, %v322_v24, 0 }
 0x12f   : > { %337 = vmatpush.bf16.xpose.msra.mxu1 %v328_v26 }
 0x135   : > { %v391_v27 = vpop.permute.xlu0 %390 }
 0x136   : > { %v527_v28 = vpop.permute.xlu1 %526  ;;  %766 = vmatmul.msk.bf16.vlgmr.msra.gmra.mxu1 %vm323_vm2, %v309_v7  ;;  %v396_v29 = vsel %vm323_vm2, %v391_v27, 0 }
 0x137   : > { %405 = vmatpush.bf16.xpose.msra.mxu3 %v396_v29  ;;  %v532_v30 = vsel %vm323_vm2, %v527_v28, 0 }
 0x13d   : > { %v454_v31 = vpop.permute.xlu0 %453 }
 0x13e   : > { %768 = vmatmul.msk.bf16.vlgmr.msra.gmra.mxu3 %vm323_vm2, %v386_v25  ;;  %770 = vmatmul.msk.bf16.vlgmr.msrb.gmra.mxu0 %vm323_vm2, %v454_v31 }
 0x13f   : > { %541 = vmatpush.bf16.xpose.msrb.mxu3 %v532_v30 }
 0x14e   : > { %772 = vmatmul.msk.bf16.vlgmr.msrb.gmra.mxu3 %vm323_vm2, %v522_v21 }
 0x1b3   : > { %v339_v35 = vpop.f32.mrf.mxu1 }
 0x1b4   : > { %v343_v36 = vsel %vm316_vm3, %v339_v35, -inf }
 0x1b5   : > { %v344_v37 = vsel %vm323_vm2, %v343_v36, -inf }
 0x1b6   : > { %345 = vmax.xlane.f32.xlu1 %v344_v37 }
 0x1bb   : > { %v341_v38 = vpop.f32.mrf.mxu1  ;;  %v475_v39 = vpop.f32.mrf.mxu0 }
 0x1bc   : > { %v479_v44 = vsel %vm316_vm3, %v475_v39, -inf }
 0x1bd   : > { %v480_v46 = vsel %vm323_vm2, %v479_v44, -inf }
 0x1c1   : > { %v407_v40 = vpop.f32.mrf.mxu3 }
 0x1c2   : > { %v411_v41 = vsel %vm316_vm3, %v407_v40, -inf }
 0x1c3   : > { %v477_v42 = vpop.f32.mrf.mxu0  ;;  %v412_v43 = vsel %vm323_vm2, %v411_v41, -inf }
 0x1c4   : > { %413 = vmax.xlane.f32.xlu2 %v412_v43  ;;  %v790_v43 = vld [vmem:[#allocation9 + $0x8] sm:$0xff] }
 0x1c5   : > { %619 = vmatpush.bf16.msra.mxu0 %v790_v43 }
 0x1c9   : > { %v409_v45 = vpop.f32.mrf.mxu3 }
 0x1cc   : > { %481 = vmax.xlane.f32.xlu2 %v480_v46 }
 0x1d1   : > { %v543_v47 = vpop.f32.mrf.mxu3 }
 0x1d2   : > { %v547_v48 = vsel %vm316_vm3, %v543_v47, -inf }
 0x1d3   : > { %v548_v49 = vsel %vm323_vm2, %v547_v48, -inf }
 0x1d4   : > { %549 = vmax.xlane.f32.xlu0 %v548_v49  ;;  %v890_v49 = vld [vmem:[%s1322_s3] ss:$0 sm:$0xff] }
 0x1d9   : > { %v545_v50 = vpop.f32.mrf.mxu3 }
 0x1e4   : > { %356 = vrot.lane.b32.xlu2 %v1235_v10, %s1096_s5  ;;  %s641_s5 = sshll.u32 %s261_s30, 4  ;;  %s642_s5 = int_to_ptr.vmem [resolvable:$true] %s641_s5 }
 0x1ec   : > { %560 = vrot.lane.b32.xlu2 %v525_v20, %s1097_s6  ;;  %s643_s6 = sshll.u32 %s639_s27, 4  ;;  %s644_s6 = int_to_ptr.hbm [resolvable:$true] %s643_s6 }
 0x229   : > { %v346_v51 = vpop.xlane.xlu1 %345 }
 0x22a   : > { %v347_v52 = vsub.f32 %v343_v36, %v346_v51 }
 0x22c   : > { %v348_v53 = vmul.f32 1.442695, %v347_v52 }
 0x22e   : > { %891 = vpow2.f32 %v348_v53 }
 0x234   : > { %v892_v54 = vpop.eup %891 }
 0x235   : > { %v350_v55 = vsel %vm323_vm2, %v892_v54, 0.0 }
 0x236   : > { %351 = vadd.xlane.f32.xlu1 %v350_v55 }
 0x237   : > { %v414_v56 = vpop.xlane.xlu2 %413 }
 0x238   : > { %v415_v59 = vsub.f32 %v411_v41, %v414_v56 }
 0x23a   : > { %v416_v61 = vmul.f32 1.442695, %v415_v59 }
 0x23f   : > { %v482_v57 = vpop.xlane.xlu2 %481 }
 0x240   : > { %v483_v58 = vsub.f32 %v479_v44, %v482_v57  ;;  %v789_v44 = vld [vmem:[#allocation9] sm:$0xff] }
 0x241   : > { %620 = vmatpush.bf16.msra.mxu0 %v789_v44 }
 0x242   : > { %v484_v60 = vmul.f32 1.442695, %v483_v58 }
 0x244   : > { %893 = vpow2.f32 %v484_v60 }
 0x245   : > { %895 = vpow2.f32 %v416_v61 }
 0x247   : > { %v550_v62 = vpop.xlane.xlu0 %549  ;;  %v357_v63 = vpop.permute.xlu2 %356 }
 0x248   : > { %v363_v0 = vsel %vm361_vm4, %v357_v63, 0  ;;  %v551_v2 = vsub.f32 %v547_v48, %v550_v62 }
 0x249   : > { %372 = vmatpush.bf16.msra.mxu2 %v363_v0 }
 0x24a   : > { %v894_v1 = vpop.eup %893  ;;  %v552_v4 = vmul.f32 1.442695, %v551_v2 }
 0x24b   : > { %v486_v3 = vsel %vm323_vm2, %v894_v1, 0.0  ;;  %v896_v5 = vpop.eup %895 }
 0x24c   : > { %487 = vadd.xlane.f32.xlu0 %v486_v3  ;;  %897 = vpow2.f32 %v552_v4  ;;  %v418_v6 = vsel %vm323_vm2, %v896_v5, 0.0 }
 0x24f   : > { %424 = vrot.lane.b32.xlu1 %v1238_v18, %s1098_s7  ;;  %v561_v14 = vpop.permute.xlu2 %560  ;;  %s1011_s7 = sshra.s32 %s644_s6, 4  ;;  %s1012_s7 = int_to_ptr.hbm [resolvable:$true] %s1011_s7 }
 0x250   : > { %v566_v17 = vsel %vm361_vm4, %v561_v14, 0  ;;  %p1018_p9 = scmp.lt.s32.totalorder %s1012_s7, %s1323_s4 }
 0x252   : > { %v898_v7 = vpop.eup %897 }
 0x253   : > { %v554_v8 = vsel %vm323_vm2, %v898_v7, 0.0 }
 0x254   : > { %419 = vadd.xlane.f32.xlu0 %v418_v6 }
 0x25c   : > { %555 = vadd.xlane.f32.xlu0 %v554_v8 }
 0x270   : > { %492 = vrot.lane.b32.xlu0 %v1240_v19, %s1099_s8  ;;  %s1013_s8 = scalar_lea.hbm %s1012_s7, 8 }
 0x271   : > { %p1014_p1 = scmp.ne.s32.totalorder %s1012_s7, %s1013_s8 }
 0x273   : > { %p1015_p3 = pnand %p1014_p1, %p1202_p0 }
 0x275   : > { %p1016_p8 = pneg %p1015_p3 }
 0x2a9   : > { %v352_v9 = vpop.xlane.xlu1 %351 }
 0x2aa   : > { %899 = vrcp.f32 %v352_v9 }
 0x2b0   : > { %v900_v10 = vpop.eup %899 }
 0x2b1   : > { %v354_v11 = vmul.f32 %v900_v10, %v892_v54 }
 0x2b3   : > { %v355_v12 = vpack.c.bf16 %v354_v11, %v354_v11 }
 0x2b5   : > { %767 = vmatmul.msk.bf16.vlgmr.msra.gmra.mxu2 %vm323_vm2, %v355_v12 }
 0x2bf   : > { %v488_v13 = vpop.xlane.xlu0 %487 }
 0x2c1   : > { %v425_v15 = vpop.permute.xlu1 %424 }
 0x2c2   : > { %v430_v16 = vsel %vm361_vm4, %v425_v15, 0 }
 0x2c3   : > { %439 = vmatpush.bf16.msrb.mxu2 %v430_v16 }
 0x2c7   : > { %575 = vmatpush.bf16.msra.mxu2 %v566_v17  ;;  %v420_v18 = vpop.xlane.xlu0 %419 }
 0x2c8   : > { %901 = vrcp.f32 %v420_v18 }
 0x2ce   : > { %v902_v20 = vpop.eup %901 }
 0x2cf   : > { %v422_v19 = vmul.f32 %v902_v20, %v896_v5  ;;  %v556_v21 = vpop.xlane.xlu0 %555 }
 0x2d0   : > { %903 = vrcp.f32 %v556_v21 }
 0x2d1   : > { %v423_v22 = vpack.c.bf16 %v422_v19, %v422_v19  ;;  %905 = vrcp.f32 %v488_v13 }
 0x2d3   : > { %769 = vmatmul.msk.bf16.vlgmr.msrb.gmra.mxu2 %vm323_vm2, %v423_v22 }
 0x2d6   : > { %v904_v23 = vpop.eup %903 }
 0x2d7   : > { %v558_v24 = vmul.f32 %v904_v23, %v898_v7  ;;  %v906_v25 = vpop.eup %905 }
 0x2d8   : > { %v490_v26 = vmul.f32 %v906_v25, %v894_v1 }
 0x2d9   : > { %v559_v27 = vpack.c.bf16 %v558_v24, %v558_v24 }
 0x2da   : > { %v491_v30 = vpack.c.bf16 %v490_v26, %v490_v26 }
 0x2e2   : > { %v493_v28 = vpop.permute.xlu0 %492 }
 0x2e3   : > { %773 = vmatmul.msk.bf16.vlgmr.msra.gmra.mxu2 %vm323_vm2, %v559_v27  ;;  %v498_v29 = vsel %vm361_vm4, %v493_v28, 0 }
 0x2e4   : > { %507 = vmatpush.bf16.msrb.mxu1 %v498_v29 }
 0x2e7   : > { %771 = vmatmul.msk.bf16.vlgmr.msrb.gmra.mxu1 %vm323_vm2, %v491_v30 }
 0x338   : > { %v374_v31 = vpop.f32.mrf.mxu2 }
 0x339   : > { %v378_v32 = vpack.c.bf16 %v374_v31, %v374_v31 }
 0x33b   : > { %380 = vst.msk [vmem:[#allocation3] sm:$0xf] %vm379_vm5, %v378_v32 }
 0x340   : > { %v376_v33 = vpop.f32.mrf.mxu2 }
 0x356   : > { %v441_v34 = vpop.f32.mrf.mxu2 }
 0x357   : > { %v445_v35 = vpack.c.bf16 %v441_v34, %v441_v34 }
 0x359   : > { %447 = vrot.lane.b32.xlu1 %v445_v35, %s1100_s9 }
 0x35e   : > { %v443_v36 = vpop.f32.mrf.mxu2 }
 0x364   : > { %v509_v37 = vpop.f32.mrf.mxu1 }
 0x365   : > { %v513_v38 = vpack.c.bf16 %v509_v37, %v509_v37 }
 0x366   : > { %v577_v39 = vpop.f32.mrf.mxu2 }
 0x367   : > { %v581_v40 = vpack.c.bf16 %v577_v39, %v577_v39  ;;  %515 = vrot.lane.b32.xlu2 %v513_v38, %s1101_s12 }
 0x369   : > { %583 = vrot.lane.b32.xlu1 %v581_v40, %s1102_s13  ;;  %s1017_s13 = scalar_lea.hbm %s1323_s4, 16 }
 0x36a   : > { %p1019_p10 = scmp.lt.s32.totalorder %s1017_s13, %s1013_s8 }
 0x36c   : > { %v511_v41 = vpop.f32.mrf.mxu1  ;;  %p1020_p12 = por %p1019_p10, %p1018_p9 }
 0x36e   : > { %v579_v42 = vpop.f32.mrf.mxu2  ;;  %p1021_p13 = pnand %p1020_p12, %p1016_p8 }
 0x3c1   : > { %v516_v46 = vpop.permute.xlu2 %515 }
 0x3cb   : > { %v448_v45 = vpop.permute.xlu1 %447 }
 0x3cc   : > { %451 = vst.msk [vmem:[#allocation3] sm:$0xf] %vm450_vm6, %v448_v45 }
 0x3cd   : > { %519 = vst.msk [vmem:[#allocation3] sm:$0xf] %vm518_vm7, %v516_v46 }
 0x3db   : > { %v584_v47 = vpop.permute.xlu1 %583 }
 0x3dc   : > { %587 = vst.msk [vmem:[#allocation3] sm:$0xf] %vm586_vm8, %v584_v47 }
 0x3e3   : > { %v588_v48 = vld [vmem:[#allocation3] sm:$0xf] }
 0x3e4   : > { %782 = vmatmul.msk.bf16.vlgmr.msra.gmra.mxu0 %vm284_vm0, %v588_v48 }
 0x461   : > { %v622_v50 = vpop.f32.mrf.mxu0 }
 0x462   : > { %v623_v51 = vadd.f32 %v890_v49, %v622_v50 }
 0x464   : > { %626 = vst.msk [vmem:[%s261_s30] sm:$0xff] %vm284_vm0, %v623_v51 }
 0x465   : > { %1024 = shalt.err (!%p1021_p13)
}
 0x466   : > { %801 = dma.vmem_to_hbm [thread:$0]  (%p1202_p0), %s642_s5, 128, %s644_s6, %s628_s18  }
 0x469   : > { %v624_v52 = vpop.f32.mrf.mxu0 }
 0x46a PF: > { %s655_s11 = sand.u32 1, %s1063_s15   ;;  %p815_p2 = pnand %p749_p6, %p1209_p5 }
 0x46b   : > { %s656_s26 = scalar_lea.sflag [#allocation6], %s655_s11 }
 0x46c   : > { %p816_p4 = pneg %p815_p2 }
 0x46e   : > { %1058 = dma.done.wait (%p816_p4), %s656_s26, 128  }
 0x46f   : > { %1060 = vsyncadd (%p816_p4), %s656_s26, 4294967168  ;;  %s21_s20 = sadd.s32 1, %s1083_s20   ;;  %s1329_s15 = smov %s1067_s16 }
 0x470   : > { %p18_p7 = scmp.ge.s32.totalorder %s21_s20, 4   ;;  %s1330_s16 = smov %s1071_s17 }
 0x471   : > { %s1331_s17 = smov %s1207_s24  ;;  %s1332_s18 = smov %s1079_s19 }
 0x472   : > { %s1333_s19 = smov %s1335_s10  ;;  %20 = sbr.rel (!%p18_p7) target bundleno = 7 (0x7), region = 94 }
 0x477   :  { %662 = vsyncpa [#allocation5], 1 }
 0x478   :  { %664 = vsyncpa [#allocation5 + $0x1], 1 }
 0x479   :  { %665 = vsyncpa [#allocation8], 1 }
 0x47a   :  { %666 = vsyncpa [#allocation6], 1 }
 0x47b   :  { %668 = vsyncpa [#allocation6 + $0x1], 1 }

</bundles_post_ra>
